<compile_context>
chip_gen: v7x
topology: tpu7x:2x2x1
jax: 0.10.0
libtpu: 0.0.40
codegen_flags: <defaults>
</compile_context>

<pallas_src>
import jax
import jax.numpy as jnp
from jax.experimental import pallas as pl
from jax.experimental.pallas import tpu as pltpu


def _round_up(a, b):
    return (a + b - 1) // b * b


def _gps_mlp_kernel(x_ref, w1_ref, b1_ref, w2_ref, b2_ref, o_ref):
    # x_ref : (TM, 2)      GPS coords, row-major tile
    # w1_ref: (2, H)       first linear weight (H = 2*dim)
    # b1_ref: (1, H)       first bias (row)
    # w2_ref: (H, dim)     second linear weight
    # b2_ref: (1, dim)     second bias (row)
    # o_ref : (TM, dim)    row-major output tile
    x = x_ref[...].astype(jnp.float32)
    w1 = w1_ref[...].astype(jnp.float32)

    # Layer 1: K=2 contraction as two VPU broadcast-FMAs (an MXU pass would be
    # ~99% padding); bias add + ReLU kept in f32.
    h = x[:, 0:1] * w1[0:1, :] + x[:, 1:2] * w1[1:2, :] + b1_ref[...]
    h = jnp.maximum(h, 0.0)                                  # (TM, H), f32

    # Layer 2: single-pass bf16 MXU matmul with f32 accumulation.  The explicit
    # casts avoid the default f32 x f32 lowering (3-6 bf16 passes per tile).
    out = jnp.dot(
        h.astype(jnp.bfloat16),
        w2_ref[...].astype(jnp.bfloat16),
        preferred_element_type=jnp.float32,
    )
    out = out + b2_ref[...]
    o_ref[...] = out.astype(o_ref.dtype)


def _pick_tile_m(n, dim):
    """Row-tile size: big enough that HBM traffic (not the per-step overhead)
    dominates, small enough to fit comfortably in scoped VMEM on all chips and
    to leave >= 2 grid steps for the two v7x TensorCores."""
    hidden = 2 * dim
    # Per-row f32 VMEM bytes: x (double-buffered) + h scratch + out (double-buffered).
    row_bytes = 4 * (2 * 2 + hidden + 2 * dim)
    budget = max(256, min(8192, (6 << 20) // row_bytes))
    budget = max(256, (budget // 256) * 256)
    if n <= 1024:
        return max(n, 1)                       # single exact block, no padding needed
    # Keep >= 2 parallel grid steps (megacore / dual-TC on v7x).
    return min(budget, max(256, _round_up(pl.cdiv(n, 2), 256)))


def gps_embedding(x, w1, b1, w2, b2, *, tile_m=None):
    """Pallas forward pass of GPSEmbedding.

    x  : (..., 2)
    w1 : (2, 2*dim), b1 : (2*dim,)
    w2 : (2*dim, dim), b2 : (dim,)
    returns (..., dim)
    """
    hidden, dim = w2.shape
    lead_shape = x.shape[:-1]
    n = 1
    for s in lead_shape:
        n *= s

    if tile_m is None:
        tile_m = _pick_tile_m(n, dim)
    else:
        tile_m = min(tile_m, n)
        if tile_m < n:                          # must be sublane-aligned unless == n
            tile_m = max(8, (tile_m // 8) * 8)

    grid_m = pl.cdiv(n, tile_m)

    x2 = x.reshape(n, 2)
    b1_r = b1.reshape(1, hidden)
    b2_r = b2.reshape(1, dim)

    # Scheduler hint: memory-bound (per row: ~5*H VPU flops + 2*H*dim MXU flops).
    cost = pl.CostEstimate(
        flops=int(n) * (5 * hidden + 2 * hidden * dim),
        transcendentals=0,
        bytes_accessed=int(n) * 4 * (2 + dim)
        + 4 * (w1.size + b1.size + w2.size + b2.size),
    )

    out = pl.pallas_call(
        _gps_mlp_kernel,
        out_shape=jax.ShapeDtypeStruct((n, dim), x.dtype),
        grid_spec=pl.GridSpec(
            grid=(grid_m,),
            in_specs=[
                pl.BlockSpec((tile_m, 2), lambda i: (i, 0)),     # x row tile
                pl.BlockSpec((2, hidden), lambda i: (0, 0)),     # W1 (constant)
                pl.BlockSpec((1, hidden), lambda i: (0, 0)),     # b1 (constant)
                pl.BlockSpec((hidden, dim), lambda i: (0, 0)),   # W2 (constant)
                pl.BlockSpec((1, dim), lambda i: (0, 0)),        # b2 (constant)
            ],
            out_specs=pl.BlockSpec((tile_m, dim), lambda i: (i, 0)),
        ),
        compiler_params=pltpu.CompilerParams(
            dimension_semantics=("parallel",),
            # Explicit: v5e's scoped-VMEM default is only 16 MiB; 32 MiB is safe
            # on v5e/v6e (128 MiB physical) and leaves headroom on v7x (64 MiB).
            vmem_limit_bytes=32 * 1024 * 1024,
        ),
        cost_estimate=cost,
    )(x2, w1, b1_r, w2, b2_r)

    return out.reshape(*lead_shape, dim)


def init_params(key, dim):
    """Deterministic init matching nn.Linear shapes (Kaiming-uniform-ish).
    Weights are stored as (in, out), i.e. transposed vs PyTorch's (out, in)."""
    hidden = dim * 2
    k1, k2, k3, k4 = jax.random.split(key, 4)
    bound1 = 1.0 / jnp.sqrt(2.0)
    w1 = jax.random.uniform(k1, (2, hidden), jnp.float32, -bound1, bound1)
    b1 = jax.random.uniform(k2, (hidden,), jnp.float32, -bound1, bound1)
    bound2 = 1.0 / jnp.sqrt(float(hidden))
    w2 = jax.random.uniform(k3, (hidden, dim), jnp.float32, -bound2, bound2)
    b2 = jax.random.uniform(k4, (dim,), jnp.float32, -bound2, bound2)
    return w1, b1, w2, b2


def reference(x, w1, b1, w2, b2):
    h = jnp.maximum(x @ w1 + b1, 0.0)
    return h @ w2 + b2


if __name__ == "__main__":
    key = jax.random.PRNGKey(0)
    kx, kx2, kp = jax.random.split(key, 3)

    dim = 32
    w1, b1, w2, b2 = init_params(kp, dim)

    # Small shape: single exact block (grid = 1).
    batch, seq = 2, 8
    x = jax.random.normal(kx, (batch, seq, 2), jnp.float32)
    out = jax.block_until_ready(gps_embedding(x, w1, b1, w2, b2))
    ref = reference(x, w1, b1, w2, b2)
    assert out.shape == (batch, seq, dim), out.shape
    # Layer 2 runs in bf16 on the MXU (f32 accumulation) -> compare loosely
    # against the pure-f32 reference (explicit speed/precision trade-off).
    assert jnp.allclose(out, ref, atol=3e-2, rtol=3e-2), float(
        jnp.max(jnp.abs(out - ref))
    )

    # Ragged multi-tile shape: exercises the partial last block + parallel grid.
    xb = jax.random.normal(kx2, (3, 500, 2), jnp.float32)
    out2 = jax.block_until_ready(gps_embedding(xb, w1, b1, w2, b2))
    ref2 = reference(xb, w1, b1, w2, b2)
    assert out2.shape == (3, 500, dim), out2.shape
    assert jnp.allclose(out2, ref2, atol=3e-2, rtol=3e-2), float(
        jnp.max(jnp.abs(out2 - ref2))
    )

    print("KERNEL_OK")
</pallas_src>

<mosaic_0001>
module attributes {stable_mosaic.version = 11 : i64} {
  func.func @_gps_mlp_kernel(%arg0: i32, %arg1: memref<16x2xf32, #tpu.memory_space<vmem>>, %arg2: memref<2x64xf32, #tpu.memory_space<vmem>>, %arg3: memref<1x64xf32, #tpu.memory_space<vmem>>, %arg4: memref<64x32xf32, #tpu.memory_space<vmem>>, %arg5: memref<1x32xf32, #tpu.memory_space<vmem>>, %arg6: memref<16x32xf32, #tpu.memory_space<vmem>>) attributes {dimension_semantics = [#tpu.dimension_semantics<parallel>], iteration_bounds = array<i64: 1>, scalar_prefetch = 0 : i64, scratch_operands = 0 : i64, tpu.core_type = #tpu.core_type<tc>, window_params = [{transform_indices = @transform_0, window_bounds = array<i64: 16, 2>}, {pipeline_mode = #tpu.pipeline_mode<synchronous>, transform_indices = @transform_1, window_bounds = array<i64: 2, 64>}, {pipeline_mode = #tpu.pipeline_mode<synchronous>, transform_indices = @transform_2, window_bounds = array<i64: 1, 64>}, {pipeline_mode = #tpu.pipeline_mode<synchronous>, transform_indices = @transform_3, window_bounds = array<i64: 64, 32>}, {pipeline_mode = #tpu.pipeline_mode<synchronous>, transform_indices = @transform_4, window_bounds = array<i64: 1, 32>}, {transform_indices = @transform_5, window_bounds = array<i64: 16, 32>}]} {
    %c0 = arith.constant 0 : index
    %c0_0 = arith.constant 0 : index
    %0 = vector.load %arg1[%c0, %c0_0] : memref<16x2xf32, #tpu.memory_space<vmem>>, vector<16x2xf32>
    %c0_1 = arith.constant 0 : index
    %c0_2 = arith.constant 0 : index
    %1 = vector.load %arg2[%c0_1, %c0_2] : memref<2x64xf32, #tpu.memory_space<vmem>>, vector<2x64xf32>
    %2 = vector.extract_strided_slice %0 {offsets = [0, 0], sizes = [16, 1], strides = [1, 1]} : vector<16x2xf32> to vector<16x1xf32>
    %3 = vector.extract_strided_slice %1 {offsets = [0, 0], sizes = [1, 64], strides = [1, 1]} : vector<2x64xf32> to vector<1x64xf32>
    %4 = vector.broadcast %2 : vector<16x1xf32> to vector<16x64xf32>
    %5 = vector.broadcast %3 : vector<1x64xf32> to vector<16x64xf32>
    %6 = arith.mulf %4, %5 : vector<16x64xf32>
    %7 = vector.extract_strided_slice %0 {offsets = [0, 1], sizes = [16, 1], strides = [1, 1]} : vector<16x2xf32> to vector<16x1xf32>
    %8 = vector.extract_strided_slice %1 {offsets = [1, 0], sizes = [1, 64], strides = [1, 1]} : vector<2x64xf32> to vector<1x64xf32>
    %9 = vector.broadcast %7 : vector<16x1xf32> to vector<16x64xf32>
    %10 = vector.broadcast %8 : vector<1x64xf32> to vector<16x64xf32>
    %11 = arith.mulf %9, %10 : vector<16x64xf32>
    %12 = arith.addf %6, %11 : vector<16x64xf32>
    %c0_3 = arith.constant 0 : index
    %c0_4 = arith.constant 0 : index
    %13 = vector.load %arg3[%c0_3, %c0_4] : memref<1x64xf32, #tpu.memory_space<vmem>>, vector<1x64xf32>
    %14 = vector.broadcast %13 : vector<1x64xf32> to vector<16x64xf32>
    %15 = arith.addf %12, %14 : vector<16x64xf32>
    %cst = arith.constant 0.000000e+00 : f32
    %16 = vector.broadcast %cst : f32 to vector<16x64xf32>
    %17 = arith.maximumf %15, %16 : vector<16x64xf32>
    %18 = arith.truncf %17 : vector<16x64xf32> to vector<16x64xbf16>
    %c0_5 = arith.constant 0 : index
    %c0_6 = arith.constant 0 : index
    %19 = vector.load %arg4[%c0_5, %c0_6] : memref<64x32xf32, #tpu.memory_space<vmem>>, vector<64x32xf32>
    %20 = arith.truncf %19 : vector<64x32xf32> to vector<64x32xbf16>
    %cst_7 = arith.constant dense<0.000000e+00> : vector<16x32xf32>
    %21 = tpu.matmul %18, %20, %cst_7 {dimension_numbers = #tpu.dot_dimension_numbers<[1], [0], [0], [1], [0, 0, 1, 1], [], []>} : vector<16x64xbf16>, vector<64x32xbf16>, vector<16x32xf32> -> vector<16x32xf32>
    %c0_8 = arith.constant 0 : index
    %c0_9 = arith.constant 0 : index
    %22 = vector.load %arg5[%c0_8, %c0_9] : memref<1x32xf32, #tpu.memory_space<vmem>>, vector<1x32xf32>
    %23 = vector.broadcast %22 : vector<1x32xf32> to vector<16x32xf32>
    %24 = arith.addf %21, %23 : vector<16x32xf32>
    %c0_10 = arith.constant 0 : index
    %c0_11 = arith.constant 0 : index
    %25 = vector.load %arg6[%c0_10, %c0_11] : memref<16x32xf32, #tpu.memory_space<vmem>>, vector<16x32xf32>
    tpu.vector_store %arg6[%c0_10, %c0_11], %24 {strides = array<i32>} : memref<16x32xf32, #tpu.memory_space<vmem>>, vector<16x32xf32>,
    return
  }
  func.func @transform_0(%arg0: i32) -> (i32, i32) {
    %c0_i32 = arith.constant 0 : i32
    %c0_i32_0 = arith.constant 0 : i32
    return %arg0, %c0_i32 : i32, i32
  }
  func.func @transform_1(%arg0: i32) -> (i32, i32) {
    %c0_i32 = arith.constant 0 : i32
    %c0_i32_0 = arith.constant 0 : i32
    %c0_i32_1 = arith.constant 0 : i32
    return %c0_i32, %c0_i32_0 : i32, i32
  }
  func.func @transform_2(%arg0: i32) -> (i32, i32) {
    %c0_i32 = arith.constant 0 : i32
    %c0_i32_0 = arith.constant 0 : i32
    %c0_i32_1 = arith.constant 0 : i32
    return %c0_i32, %c0_i32_0 : i32, i32
  }
  func.func @transform_3(%arg0: i32) -> (i32, i32) {
    %c0_i32 = arith.constant 0 : i32
    %c0_i32_0 = arith.constant 0 : i32
    %c0_i32_1 = arith.constant 0 : i32
    return %c0_i32, %c0_i32_0 : i32, i32
  }
  func.func @transform_4(%arg0: i32) -> (i32, i32) {
    %c0_i32 = arith.constant 0 : i32
    %c0_i32_0 = arith.constant 0 : i32
    %c0_i32_1 = arith.constant 0 : i32
    return %c0_i32, %c0_i32_0 : i32, i32
  }
  func.func @transform_5(%arg0: i32) -> (i32, i32) {
    %c0_i32 = arith.constant 0 : i32
    %c0_i32_0 = arith.constant 0 : i32
    return %arg0, %c0_i32 : i32, i32
  }
}

</mosaic_0001>

<bundles_post_ra>
// kernel: tpu_custom_call.1
= control target key start
LH: loop header
LB: loop body
LE: loop exit
PB: predicated region body
PF: predicated region fallthrough
CT: control target
= control target key end

     0   :  { %v206_v2 = vmov 1   ;;  %v207_v3 = vmov 0   ;;  %s294_s0 = inlined_call_operand.vmem [shape: f32[16,2], index: 0, kind: input, shape index: {}]   ;;  %s295_s1 = inlined_call_operand.vmem [shape: f32[2,64], index: 1, kind: input, shape index: {}]   ;;  %s296_s2 = inlined_call_operand.vmem [shape: f32[1,64], index: 2, kind: input, shape index: {}]   ;;  %s297_s3 = inlined_call_operand.vmem [shape: f32[64,32], index: 3, kind: input, shape index: {}]   ;;  %s298_s4 = inlined_call_operand.vmem [shape: f32[1,32], index: 4, kind: input, shape index: {}]   ;;  %s299_s5 = inlined_call_operand.hbm [shape: f32[16,32], index: 5, kind: output, shape index: {}]  }
   0x1   :  { %v22_v0 = vld [vmem:[%s294_s0] sm:$0xff]  ;;  %180 = vset.pattern.permute.xlu1 %v206_v2  ;;  %179 = vset.pattern.permute.xlu0 %v207_v3  ;;  %v70_v4 = vld [vmem:[%s297_s3 + $0x8] sm:$0xff] }
   0x2   :  { %v69_v1 = vld [vmem:[%s297_s3] sm:$0xff] }
   0x3   :  { %10 = vsyncpa [#allocation3], 0  ;;  %42 = vperm.xlu1 %180, %v22_v0   ;;  %27 = vperm.xlu0 %179, %v22_v0   ;;  %v77_v5 = vpack.c.bf16 %v70_v4, %v69_v1  ;;  %v71_v6 = vld [vmem:[%s297_s3 + $0x10] sm:$0xff]  ;;  %v72_v7 = vld [vmem:[%s297_s3 + $0x18] sm:$0xff]  ;;  %v208_v9 = vmov 0.0   ;;  %vm209_vm0 = vmmov 0   ;;  %v35_v17 = vlaneseq }
   0x4   :  { %v23_v8 = vld [vmem:[%s294_s0 + $0x8] sm:$0xff]  ;;  %160 = vmatprep.subr.bf16.mxu0 %v208_v9  ;;  %v78_v10 = vpack.c.bf16 %v72_v7, %v71_v6  ;;  %v73_v11 = vld [vmem:[%s297_s3 + $0x20] sm:$0xff]  ;;  %v75_v14 = vld [vmem:[%s297_s3 + $0x30] sm:$0xff]  ;;  %168 = vmatprep.mubr.msk.bf16.mxu0 %vm209_vm0, %v208_v9  ;;  %vm88_vm1 = vcmask 523264   ;;  %s210_s16 = smov [#allocation2]   ;;  %vm133_vm2 = vcmask 261120  }
   0x5   :  { %161 = vmatpush3.bf16.msra.mxu0 %v77_v5  ;;  %v74_v12 = vld [vmem:[%s297_s3 + $0x28] sm:$0xff]  ;;  %v76_v15 = vld [vmem:[%s297_s3 + $0x38] sm:$0xff]  ;;  %v36_v18 = vshrl.u32 %v35_v17, 7  ;;  %v24_v21 = vld [vmem:[%s295_s1] sm:$0x3]  ;;  %s141_s17 = sshll.u32 %s210_s16, 4  ;;  %s142_s17 = int_to_ptr.vmem [resolvable:$true] %s141_s17 }
   0x6   :  { %162 = vmatprep.subr.bf16.mxu0 %v208_v9  ;;  %v79_v13 = vpack.c.bf16 %v74_v12, %v73_v11  ;;  %v80_v16 = vpack.c.bf16 %v76_v15, %v75_v14  ;;  %v152_v29 = vld [vmem:[%s296_s2] ss:$0 sm:$0xff]  ;;  %s182_s2 = scalar_lea.vmem %s142_s17, 256  ;;  %p187_p1 = scmp.lt.s32.totalorder %s142_s17, %s142_s17 }
   0x7   :  { %46 = vperm.xlu1 %180, %v23_v8   ;;  %32 = vperm.xlu0 %179, %v23_v8   ;;  %v51_v19 = vsub.s32 1, %v36_v18  ;;  %v37_v20 = vsub.s32 0, %v36_v18  ;;  %v153_v40 = vld [vmem:[%s298_s4] ss:$0 sm:$0xff]  ;;  %p183_p0 = scmp.ne.s32.totalorder %s142_s17, %s182_s2  ;;  %p188_p2 = scmp.lt.s32.totalorder %s182_s2, %s182_s2 }
   0x9   :  { %163 = vmatpush3.bf16.msra.mxu0 %v78_v10  ;;  %v52_v22 = vrot.slane %v24_v21, %v51_v19  ;;  %v38_v23 = vrot.slane %v24_v21, %v37_v20  ;;  %p189_p3 = por %p188_p2, %p187_p1 }
   0xa   :  { %164 = vmatprep.subr.bf16.mxu0 %v208_v9 }
   0xb   :  { %181 = vset.pattern.permute.xlu0 %v206_v2  ;;  %p190_p4 = pnand %p189_p3, %p183_p0 }
   0xd   :  { %165 = vmatpush3.bf16.msra.mxu0 %v79_v13 }
   0xe   :  { %166 = vmatprep.subr.bf16.mxu0 %v208_v9 }
  0x11   :  { %167 = vmatpush3.bf16.msra.mxu0 %v80_v16 }
  0x82   :  { %v43_v24 = vpop.permute.xlu1 %42  ;;  %v28_v25 = vpop.permute.xlu0 %27 }
  0x83   :  { %v53_v26 = vmul.f32 %v52_v22, %v43_v24  ;;  %v39_v27 = vmul.f32 %v38_v23, %v28_v25 }
  0x85   :  { %v55_v28 = vadd.f32 %v53_v26, %v39_v27 }
  0x86   :  { %v47_v30 = vpop.permute.xlu1 %46  ;;  %v33_v31 = vpop.permute.xlu0 %32 }
  0x87   :  { %v54_v32 = vmul.f32 %v52_v22, %v47_v30  ;;  %v40_v33 = vmul.f32 %v38_v23, %v33_v31  ;;  %v64_v34 = vadd.f32 %v152_v29, %v55_v28 }
  0x89   :  { %v56_v35 = vadd.f32 %v54_v32, %v40_v33  ;;  %v66_v37 = vmax.f32 %v64_v34, 0.0 }
  0x8b   :  { %v65_v36 = vadd.f32 %v152_v29, %v56_v35 }
  0x8d   :  { %v67_v38 = vmax.f32 %v65_v36, 0.0 }
  0x8f   :  { %v68_v39 = vpack.c.bf16 %v67_v38, %v66_v37 }
  0x91   :  { %169 = vmatmul.mubr.msk.bf16.vlgmr.msra.gmra.mrb[0].mxu0 %vm88_vm1, %v68_v39 }
 0x164   :  { %v126_v41 = vpop.f32.mrb[0].mxu0 }
 0x165   :  { %v127_v42 = vadd.f32 %v153_v40, %v126_v41  ;;  %v170_v43 = vpop.f32.mrb[1].mxu0 }
 0x166   :  { %v129_v44 = vpop.f32.mrb[2].mxu0 }
 0x167   :  { %134 = vst.msk [vmem:[#allocation2] sm:$0xff] %vm133_vm2, %v127_v42  ;;  %v130_v45 = vadd.f32 %v153_v40, %v129_v44  ;;  %v171_v46 = vpop.f32.mrb[3].mxu0 }
 0x169   :  { %135 = vst.msk [vmem:[#allocation2 + $0x8] sm:$0xff] %vm133_vm2, %v130_v45 }
 0x16a   :  { %193 = shalt.err (!%p190_p4)
}
 0x16b   :  { %s194_s19 = scalar_lea.hbm %s299_s5, 256 }
 0x16c   :  { %p195_p5 = scmp.ne.s32.totalorder %s299_s5, %s194_s19  ;;  %p198_p6 = scmp.lt.u32.totalorder %s194_s19, %s299_s5 }
 0x16e   :  { %p200_p7 = pnand %p198_p6, %p195_p5 }
 0x170   :  { %203 = shalt.err (!%p200_p7)
}
 0x171   :  { %s211_s24 = smov 128   ;;  %s212_s25 = smov 8  }
 0x172   :  { %147 = dma.vmem_to_hbm [thread:$0]  %s142_s17, 256, %s299_s5, [#allocation3], %s211_s24, %s211_s24, %s212_s25  }
 0x173   :  { %204 = dma.done.wait [#allocation3], 256  }
 0x174   :  { %205 = vsyncadd [#allocation3], 4294967040 }
 0x175   :  { %151 = vsyncpa [#allocation3], 1 }

</bundles_post_ra>
